<compile_context>
chip_gen: v6e
topology: v6e:2x2x1
jax: 0.10.0
libtpu: 0.0.40
codegen_flags: <defaults>
</compile_context>

<pallas_src>
import functools

import jax
import jax.numpy as jnp
from jax.experimental import pallas as pl
from jax.experimental.pallas import tpu as pltpu


def _layernorm2d_kernel(x_ref, w_ref, b_ref, o_ref, *, eps, inv_c):
    # x_ref / o_ref: (1, C, T) tile -- C on sublanes, spatial (large) on lanes.
    # w_ref / b_ref: (C, 1) float32 params, broadcast along lanes.
    x = x_ref[0].astype(jnp.float32)                     # (C, T)

    # One-pass channel statistics: sum and sum-of-squares over C.
    s1 = jnp.sum(x, axis=0, keepdims=True)               # (1, T)
    s2 = jnp.sum(x * x, axis=0, keepdims=True)           # (1, T)
    mu = s1 * inv_c
    var = s2 * inv_c - mu * mu                           # biased variance (matches torch)

    inv_std = jax.lax.rsqrt(var + eps)
    y = (x - mu) * inv_std                               # (C, T)

    w = w_ref[...]                                       # (C, 1) f32
    b = b_ref[...]                                       # (C, 1) f32
    o_ref[0] = (w * y + b).astype(o_ref.dtype)


def _choose_tile_hw(C, HW, itemsize, target_bytes=4 * 1024 * 1024):
    """Pick a lane-dense spatial tile: multiple of 128, ~target_bytes of input per step."""
    t = target_bytes // max(1, C * itemsize)
    t = (t // 128) * 128
    t = max(128, min(t, 8192))
    if t >= HW:
        return HW  # full last dim is always a legal block shape
    return t


def layernorm2d(x_nchw, weight, bias, eps=1e-6, tile_hw=None):
    """x_nchw: (N, C, H, W); weight/bias: (C,). Returns (N, C, H, W)."""
    N, C, H, W = x_nchw.shape
    dtype = x_nchw.dtype
    HW = H * W

    # NCHW -> (N, C, H*W): free, contiguous reshape (no transpose, no copy).
    x3 = x_nchw.reshape(N, C, HW)

    itemsize = jnp.dtype(dtype).itemsize
    if tile_hw is None:
        tile_hw = _choose_tile_hw(C, HW, itemsize)

    # Keep params in f32 (no downcast/upcast round-trip for bf16 inputs).
    w2 = weight.reshape(C, 1).astype(jnp.float32)
    b2 = bias.reshape(C, 1).astype(jnp.float32)

    # No explicit padding: grid uses cdiv and Pallas clips the partial last block.
    grid = (N, pl.cdiv(HW, tile_hw))

    # Double-buffered input + output tiles plus headroom; cap at 64 MiB for v7x.
    tile_bytes = C * tile_hw * itemsize
    vmem_limit = int(min(64 * 1024 * 1024, max(32 * 1024 * 1024, 6 * tile_bytes)))

    out = pl.pallas_call(
        functools.partial(_layernorm2d_kernel, eps=float(eps), inv_c=1.0 / float(C)),
        out_shape=jax.ShapeDtypeStruct((N, C, HW), dtype),
        grid_spec=pltpu.PrefetchScalarGridSpec(
            num_scalar_prefetch=0,
            grid=grid,
            in_specs=[
                pl.BlockSpec((1, C, tile_hw), lambda n, j: (n, 0, j)),  # x tile
                pl.BlockSpec((C, 1), lambda n, j: (0, 0)),              # weight
                pl.BlockSpec((C, 1), lambda n, j: (0, 0)),              # bias
            ],
            out_specs=pl.BlockSpec((1, C, tile_hw), lambda n, j: (n, 0, j)),
        ),
        compiler_params=pltpu.CompilerParams(
            dimension_semantics=("parallel", "parallel"),
            vmem_limit_bytes=vmem_limit,
        ),
    )(x3, w2, b2)

    # (N, C, H*W) -> (N, C, H, W): free reshape.
    return out.reshape(N, C, H, W)


def _reference_layernorm2d(x, weight, bias, eps=1e-6):
    # Pure-JAX reference matching the PyTorch LayerNormFunction.forward exactly.
    mu = jnp.mean(x, axis=1, keepdims=True)
    var = jnp.mean((x - mu) ** 2, axis=1, keepdims=True)
    y = (x - mu) / jnp.sqrt(var + eps)
    C = x.shape[1]
    return weight.reshape(1, C, 1, 1) * y + bias.reshape(1, C, 1, 1)


if __name__ == "__main__":
    key = jax.random.PRNGKey(0)
    kx, kw, kb = jax.random.split(key, 3)
    N, C, H, W = 2, 4, 16, 16

    x = jax.random.normal(kx, (N, C, H, W), dtype=jnp.float32)
    # Deterministic non-trivial affine params (module init is ones/zeros; these also
    # exercise the scale/shift path).
    weight = 1.0 + 0.1 * jax.random.normal(kw, (C,), dtype=jnp.float32)
    bias = 0.1 * jax.random.normal(kb, (C,), dtype=jnp.float32)

    out = layernorm2d(x, weight, bias, eps=1e-6)
    out = jax.block_until_ready(out)

    ref = _reference_layernorm2d(x, weight, bias, eps=1e-6)
    assert out.shape == (N, C, H, W)
    assert jnp.allclose(out, ref, atol=1e-5, rtol=1e-5), float(jnp.max(jnp.abs(out - ref)))

    print("KERNEL_OK")
</pallas_src>

<mosaic_0001>
module attributes {stable_mosaic.version = 11 : i64} {
  func.func @_layernorm2d_kernel(%arg0: i32, %arg1: i32, %arg2: memref<1x4x256xf32, #tpu.memory_space<vmem>>, %arg3: memref<4x1xf32, #tpu.memory_space<vmem>>, %arg4: memref<4x1xf32, #tpu.memory_space<vmem>>, %arg5: memref<1x4x256xf32, #tpu.memory_space<vmem>>) attributes {dimension_semantics = [#tpu.dimension_semantics<parallel>, #tpu.dimension_semantics<parallel>], iteration_bounds = array<i64: 2, 1>, scalar_prefetch = 0 : i64, scratch_operands = 0 : i64, tpu.core_type = #tpu.core_type<tc>, window_params = [{transform_indices = @transform_0, window_bounds = array<i64: 1, 4, 256>}, {pipeline_mode = #tpu.pipeline_mode<synchronous>, transform_indices = @transform_1, window_bounds = array<i64: 4, 1>}, {pipeline_mode = #tpu.pipeline_mode<synchronous>, transform_indices = @transform_2, window_bounds = array<i64: 4, 1>}, {transform_indices = @transform_3, window_bounds = array<i64: 1, 4, 256>}]} {
    %c0 = arith.constant 0 : index
    %c0_0 = arith.constant 0 : index
    %c0_1 = arith.constant 0 : index
    %0 = vector.load %arg2[%c0, %c0_0, %c0_1] : memref<1x4x256xf32, #tpu.memory_space<vmem>>, vector<1x4x256xf32>
    %1 = vector.shape_cast %0 : vector<1x4x256xf32> to vector<4x256xf32>
    %cst = arith.constant dense<0.000000e+00> : vector<256xf32>
    %2 = vector.multi_reduction <add>, %1, %cst [0] : vector<4x256xf32> to vector<256xf32>
    %3 = vector.shape_cast %2 : vector<256xf32> to vector<1x256xf32>
    %4 = arith.mulf %1, %1 : vector<4x256xf32>
    %cst_2 = arith.constant dense<0.000000e+00> : vector<256xf32>
    %5 = vector.multi_reduction <add>, %4, %cst_2 [0] : vector<4x256xf32> to vector<256xf32>
    %6 = vector.shape_cast %5 : vector<256xf32> to vector<1x256xf32>
    %cst_3 = arith.constant 2.500000e-01 : f32
    %7 = vector.broadcast %cst_3 : f32 to vector<1x256xf32>
    %8 = arith.mulf %3, %7 : vector<1x256xf32>
    %cst_4 = arith.constant 2.500000e-01 : f32
    %9 = vector.broadcast %cst_4 : f32 to vector<1x256xf32>
    %10 = arith.mulf %6, %9 : vector<1x256xf32>
    %11 = arith.mulf %8, %8 : vector<1x256xf32>
    %12 = arith.subf %10, %11 : vector<1x256xf32>
    %cst_5 = arith.constant 9.99999997E-7 : f32
    %13 = vector.broadcast %cst_5 : f32 to vector<1x256xf32>
    %14 = arith.addf %12, %13 : vector<1x256xf32>
    %15 = math.rsqrt %14 : vector<1x256xf32>
    %16 = vector.broadcast %8 : vector<1x256xf32> to vector<4x256xf32>
    %17 = arith.subf %1, %16 : vector<4x256xf32>
    %18 = vector.broadcast %15 : vector<1x256xf32> to vector<4x256xf32>
    %19 = arith.mulf %17, %18 : vector<4x256xf32>
    %c0_6 = arith.constant 0 : index
    %c0_7 = arith.constant 0 : index
    %20 = vector.load %arg3[%c0_6, %c0_7] : memref<4x1xf32, #tpu.memory_space<vmem>>, vector<4x1xf32>
    %c0_8 = arith.constant 0 : index
    %c0_9 = arith.constant 0 : index
    %21 = vector.load %arg4[%c0_8, %c0_9] : memref<4x1xf32, #tpu.memory_space<vmem>>, vector<4x1xf32>
    %22 = vector.broadcast %20 : vector<4x1xf32> to vector<4x256xf32>
    %23 = arith.mulf %22, %19 : vector<4x256xf32>
    %24 = vector.broadcast %21 : vector<4x1xf32> to vector<4x256xf32>
    %25 = arith.addf %23, %24 : vector<4x256xf32>
    %c0_10 = arith.constant 0 : index
    %c0_11 = arith.constant 0 : index
    %c0_12 = arith.constant 0 : index
    %26 = vector.load %arg5[%c0_10, %c0_11, %c0_12] : memref<1x4x256xf32, #tpu.memory_space<vmem>>, vector<1x4x256xf32>
    %27 = vector.shape_cast %26 : vector<1x4x256xf32> to vector<4x256xf32>
    %28 = vector.shape_cast %25 : vector<4x256xf32> to vector<1x4x256xf32>
    tpu.vector_store %arg5[%c0_10, %c0_11, %c0_12], %28 {strides = array<i32>} : memref<1x4x256xf32, #tpu.memory_space<vmem>>, vector<1x4x256xf32>,
    return
  }
  func.func @transform_0(%arg0: i32, %arg1: i32) -> (i32, i32, i32) {
    %c0_i32 = arith.constant 0 : i32
    %c0_i32_0 = arith.constant 0 : i32
    return %arg0, %c0_i32, %arg1 : i32, i32, i32
  }
  func.func @transform_1(%arg0: i32, %arg1: i32) -> (i32, i32) {
    %c0_i32 = arith.constant 0 : i32
    %c0_i32_0 = arith.constant 0 : i32
    %c0_i32_1 = arith.constant 0 : i32
    return %c0_i32, %c0_i32_0 : i32, i32
  }
  func.func @transform_2(%arg0: i32, %arg1: i32) -> (i32, i32) {
    %c0_i32 = arith.constant 0 : i32
    %c0_i32_0 = arith.constant 0 : i32
    %c0_i32_1 = arith.constant 0 : i32
    return %c0_i32, %c0_i32_0 : i32, i32
  }
  func.func @transform_3(%arg0: i32, %arg1: i32) -> (i32, i32, i32) {
    %c0_i32 = arith.constant 0 : i32
    %c0_i32_0 = arith.constant 0 : i32
    return %arg0, %c0_i32, %arg1 : i32, i32, i32
  }
}

</mosaic_0001>

<bundles_post_ra>
// kernel: tpu_custom_call.1
= control target key start
LH: loop header
LB: loop body
LE: loop exit
PB: predicated region body
PF: predicated region fallthrough
CT: control target
= control target key end

     0   :  { %8 = vsyncpa [#allocation3], 0  ;;  %s754_s0 = inlined_call_operand.hbm [shape: f32[2,4,256], index: 0, kind: input, shape index: {}]   ;;  %s755_s1 = inlined_call_operand.vmem [shape: f32[4,1], index: 1, kind: input, shape index: {}]   ;;  %s756_s2 = inlined_call_operand.vmem [shape: f32[4,1], index: 2, kind: input, shape index: {}]   ;;  %s757_s3 = inlined_call_operand.hbm [shape: f32[2,4,256], index: 3, kind: output, shape index: {}]  }
   0x1   :  { %10 = vsyncpa [#allocation3 + $0x1], 0 }
   0x2   :  { %11 = vsyncpa [#allocation4], 0 }
   0x3   :  { %13 = vsyncpa [#allocation4 + $0x1], 0  ;;  %s610_s12 = smov 0   ;;  %s612_s13 = smov 0  }
   0x4   :  { %s614_s14 = smov 0   ;;  %s616_s15 = smov 0  }
   0x5   :  { %s618_s16 = smov 0   ;;  %s620_s17 = smov 0  }
   0x6 LB: > { %s391_s18 = sadd.s32 4294967295, %s585_s17   ;;  %s392_s19 = sadd.s32 4294967294, %s585_s17   ;;  %s585_s17 = sphi %s620_s17, %s19_s17   ;;  %s581_s16 = sphi %s618_s16, %s769_s16   ;;  %s577_s15 = sphi %s616_s15, %s768_s15   ;;  %s573_s14 = sphi %s614_s14, %s767_s14   ;;  %s569_s13 = sphi %s612_s13, %s766_s13   ;;  %s565_s12 = sphi %s610_s12, %s765_s12  }
   0x7   : > { %s31_s20 = sadd.s32 1, %s581_s16  ;;  %s40_s21 = sadd.s32 1, %s573_s14 }
   0x8   : > { %p33_p0 = scmp.ge.s32.totalorder %s31_s20, 2  ;;  %p47_p1 = scmp.ne.s32.totalorder %s573_s14, %s569_s13 }
   0x9   : > { %p48_p2 = scmp.eq.s32.totalorder %s585_s17, 0  ;;  %p53_p3 = scmp.ne.s32.totalorder %s569_s13, %s565_s12 }
   0xa   : > { %s771_s20 = smov (%p33_p0, %s31_s20), 0  ;;  %p54_p5 = scmp.eq.s32.totalorder %s391_s18, 0 }
   0xb   : > { %p651_p4 = por %p48_p2, %p47_p1  ;;  %s35_s23 = ssub.s32 %s581_s16, %s771_s20 }
   0xc   : > { %p121_p6 = scmp.eq.s32.totalorder %s391_s18, 1  ;;  %p38_p7 = scmp.eq.s32.totalorder %s35_s23, 0 }
   0xd   : > { %p657_p8 = por %p54_p5, %p53_p3  ;;  %p127_p10 = scmp.eq.s32.totalorder %s392_s19, 1 }
   0xe   : > { %p661_p9 = por %p121_p6, %p47_p1  ;;  %p420_p13 = scmp.lt.s32.totalorder %s585_s17, 2 }
   0xf   : > { %s666_s26 = scalar_select %p38_p7, %s573_s14, %s40_s21  }
  0x10   : > { %p668_p11 = por %p127_p10, %p53_p3  ;;  %s153_s28 = sand.u32 1, %s573_s14  }
  0x11   : > { %s395_s29 = sshll.u32 %s153_s28, 3  ;;  %s406_s30 = sshll.u32 %s581_s16, 7 }
  0x12   : > { %s761_s27 = scalar_select %p668_p11, 1, 0 }
  0x13   : > { %s165_s6 = scalar_lea.hbm %s754_s0, %s406_s30  ;;  %s157_s7 = scalar_lea.vmem [#allocation2], %s395_s29 }
  0x14   : > { %s167_s8 = sshll.u32 %s157_s7, 4  ;;  %p681_p0 = pnand %p420_p13, %p651_p4  ;;  %s168_s8 = int_to_ptr.vmem [resolvable:$true] %s167_s8 }
  0x15   : > { %p398_p1 = scmp.ge.s32.totalorder %s585_s17, 1  ;;  %p172_p2 = scmp.lt.s32.totalorder %s585_s17, 3 }
  0x16   : > { %s154_s10 = scalar_lea.sflag [#allocation3], %s153_s28  ;;  %p479_p3 = pneg %p681_p0 }
  0x17   : > { %s490_s11 = scalar_lea.vmem %s168_s8, 128  ;;  %s587_s18 = smov [#allocation2]  }
  0x18   : > { %p491_p5 = scmp.ne.s32.totalorder %s168_s8, %s490_s11  ;;  %s495_s19 = sshll.u32 %s587_s18, 4  ;;  %s496_s19 = int_to_ptr.vmem [resolvable:$false] %s495_s19 }
  0x19   : > { %s497_s21 = scalar_lea.vmem %s496_s19, 256  ;;  %p498_p10 = scmp.lt.s32.totalorder %s168_s8, %s496_s19 }
  0x1a   : > { %p493_p6 = pnand %p491_p5, %p479_p3  ;;  %p499_p12 = scmp.lt.s32.totalorder %s497_s21, %s490_s11 }
  0x1c   : > { %p494_p7 = pneg %p493_p6  ;;  %p500_p4 = por %p499_p12, %p498_p10 }
  0x1e   : > { %p501_p13 = pnand %p500_p4, %p494_p7 }
  0x20   : > { %504 = shalt.err (!%p501_p13)
}
  0x21   : > { %415 = dma.hbm_to_vmem [thread:$0]  (!%p681_p0), %s165_s6, 128, %s168_s8, %s154_s10  }
  0x22   : > { %p173_p11 = pnand %p398_p1, %p172_p2 }
  0x23   : > { %s696_s22 = sand.u32 (!%p173_p11), 1, %s569_s13  }
  0x24   : > { %176 = sbr.rel (%p173_p11) target bundleno = 189 (0xbd), region = 32  ;;  %s399_s23 = sshll.u32 (!%p173_p11), %s696_s22, 3 }
  0x25   : > { %s179_s28 = scalar_lea.sflag (!%p173_p11), [#allocation3], %s696_s22  ;;  %s182_s29 = scalar_lea.vmem (!%p173_p11), [#allocation2], %s399_s23 }
  0x29   : > { %556 = dma.done.wait (%p657_p8), %s179_s28, 128  }
  0x2a   : > { %558 = vsyncadd (%p657_p8), %s179_s28, 4294967168  ;;  %v588_v0 = vmov 0   ;;  %v266_v1 = vld [vmem:[%s755_s1] sm:$0xf]  ;;  %vm211_vm0 = vcmask 1043456   ;;  %s407_s24 = sshll.u32 %s577_s15, 7 }
  0x2b   : > { %471 = vset.pattern.permute.xlu0 %v588_v0  ;;  %v267_v2 = vld [vmem:[%s756_s2] sm:$0xf]  ;;  %s204_s7 = scalar_lea.vmem [#allocation5], %s399_s23  ;;  %s305_s11 = scalar_lea.hbm %s757_s3, %s407_s24 }
  0x2c   : > { %270 = vperm.xlu0 %471, %v266_v1   ;;  %v207_v3 = vld [vmem:[%s182_s29] sm:$0xff]  ;;  %s307_s8 = sshll.u32 %s204_s7, 4  ;;  %s291_s18 = scalar_lea.sflag [#allocation4], %s696_s22  ;;  %s308_s8 = int_to_ptr.vmem [resolvable:$true] %s307_s8 }
  0x2d   : > { %v209_v4 = vcombine.high %v207_v3, %v207_v3  ;;  %v226_v5 = vmul.f32 %v207_v3, %v207_v3  ;;  %v212_v6 = vsel %vm211_vm0, %v207_v3, 0.0  ;;  %s505_s19 = scalar_lea.vmem %s308_s8, 128  ;;  %s589_s21 = smov [#allocation5]  }
  0x2e   : > { %v213_v9 = vrot.slane %v212_v6, 4  ;;  %p506_p8 = scmp.ne.s32.totalorder %s308_s8, %s505_s19  ;;  %s509_s15 = sshll.u32 %s589_s21, 4  ;;  %s510_s15 = int_to_ptr.vmem [resolvable:$false] %s509_s15 }
  0x2f   : > { %v219_v7 = vsel %vm211_vm0, %v209_v4, 0.0  ;;  %v228_v8 = vcombine.high %v226_v5, %v226_v5  ;;  %v230_v11 = vsel %vm211_vm0, %v226_v5, 0.0  ;;  %s511_s23 = scalar_lea.vmem %s510_s15, 256  ;;  %p512_p0 = scmp.lt.s32.totalorder %s308_s8, %s510_s15 }
  0x30   : > { %280 = vperm.xlu0 %471, %v267_v2   ;;  %v220_v10 = vrot.slane %v219_v7, 4  ;;  %v214_v13 = vadd.f32 %v213_v9, %v212_v6  ;;  %v231_v14 = vrot.slane %v230_v11, 4  ;;  %p507_p11 = pnand %p506_p8, %p661_p9  ;;  %p513_p1 = scmp.lt.s32.totalorder %s511_s23, %s505_s19 }
  0x31   : > { %v237_v12 = vsel %vm211_vm0, %v228_v8, 0.0 }
  0x32   : > { %v221_v15 = vadd.f32 %v220_v10, %v219_v7  ;;  %v238_v16 = vrot.slane %v237_v12, 4  ;;  %v215_v17 = vrot.slane %v214_v13, 2  ;;  %v232_v18 = vadd.f32 %v231_v14, %v230_v11  ;;  %p508_p12 = pneg %p507_p11  ;;  %p514_p2 = por %p513_p1, %p512_p0 }
  0x34   : > { %v222_v19 = vrot.slane %v221_v15, 2  ;;  %v239_v20 = vadd.f32 %v238_v16, %v237_v12  ;;  %v216_v21 = vadd.f32 %v215_v17, %v214_v13  ;;  %v233_v22 = vrot.slane %v232_v18, 2  ;;  %p515_p3 = pnand %p514_p2, %p508_p12 }
  0x36   : > { %v223_v23 = vadd.f32 %v222_v19, %v221_v15  ;;  %v240_v24 = vrot.slane %v239_v20, 2  ;;  %v217_v25 = vrot.slane %v216_v21, 1  ;;  %v234_v26 = vadd.f32 %v233_v22, %v232_v18 }
  0x38   : > { %v224_v27 = vrot.slane %v223_v23, 1  ;;  %v241_v28 = vadd.f32 %v240_v24, %v239_v20  ;;  %v218_v29 = vadd.f32 %v217_v25, %v216_v21  ;;  %v235_v30 = vrot.slane %v234_v26, 1 }
  0x3a   : > { %v225_v31 = vadd.f32 %v224_v27, %v223_v23  ;;  %v242_v32 = vrot.slane %v241_v28, 1  ;;  %v236_v33 = vadd.f32 %v235_v30, %v234_v26  ;;  %v244_v34 = vmul.f32 0.25, %v218_v29 }
  0x3c   : > { %v243_v35 = vadd.f32 %v242_v32, %v241_v28  ;;  %v245_v36 = vmul.f32 0.25, %v225_v31  ;;  %v246_v37 = vmul.f32 0.25, %v236_v33  ;;  %v248_v38 = vmul.f32 %v244_v34, %v244_v34 }
  0x3e   : > { %v247_v39 = vmul.f32 0.25, %v243_v35  ;;  %v249_v40 = vmul.f32 %v245_v36, %v245_v36  ;;  %v250_v41 = vsub.f32 %v246_v37, %v248_v38  ;;  %v258_v46 = vcombine.low %v244_v34, %v245_v36 }
  0x40   : > { %v251_v42 = vsub.f32 %v247_v39, %v249_v40  ;;  %v252_v43 = vadd.f32 1e-06, %v250_v41  ;;  %v260_v48 = vsub.f32 %v207_v3, %v258_v46 }
  0x42   : > { %v253_v44 = vadd.f32 1e-06, %v251_v42  ;;  %473 = vrsqrt.f32 %v252_v43 }
  0x44   : > { %475 = vrsqrt.f32 %v253_v44 }
  0x4f   : > { %v474_v45 = vpop.eup %473 }
  0x51   : > { %v476_v47 = vpop.eup %475 }
  0x52   : > { %v263_v49 = vcombine.low %v474_v45, %v476_v47 }
  0x54   : > { %v265_v50 = vmul.f32 %v263_v49, %v260_v48 }
  0x56   : > { %v274_v51 = vcombine.high %v265_v50, %v265_v50 }
  0xa7   : > { %v271_v52 = vpop.permute.xlu0 %270 }
  0xa8   : > { %v276_v53 = vmul.f32 %v271_v52, %v265_v50  ;;  %v277_v54 = vmul.f32 %v274_v51, %v271_v52 }
  0xab   : > { %v281_v55 = vpop.permute.xlu0 %280 }
  0xac   : > { %v283_v56 = vadd.f32 %v281_v55, %v276_v53  ;;  %v284_v57 = vadd.f32 %v281_v55, %v277_v54 }
  0xae   : > { %v287_v58 = vcombine.low %v283_v56, %v284_v57 }
  0xb0   : > { %289 = vst [vmem:[%s204_s7] sm:$0xff] %v287_v58 }
  0xb1   : > { %518 = shalt.err (!%p515_p3)
}
  0xb2   : > { %s519_s28 = scalar_lea.hbm %s305_s11, 128  ;;  %s523_s30 = scalar_lea.hbm %s757_s3, 256 }
  0xb3   : > { %p520_p5 = scmp.ne.s32.totalorder %s305_s11, %s519_s28  ;;  %p524_p10 = scmp.lt.s32.totalorder %s305_s11, %s757_s3 }
  0xb4   : > { %p525_p4 = scmp.lt.s32.totalorder %s523_s30, %s519_s28 }
  0xb5   : > { %p521_p6 = pnand %p520_p5, %p661_p9 }
  0xb6   : > { %p526_p13 = por %p525_p4, %p524_p10 }
  0xb7   : > { %p522_p7 = pneg %p521_p6 }
  0xb9   : > { %p527_p8 = pnand %p526_p13, %p522_p7 }
  0xbb   : > { %530 = shalt.err (!%p527_p8)
}
  0xbc   : > { %410 = dma.vmem_to_hbm [thread:$0]  (%p661_p9), %s308_s8, 128, %s305_s11, %s291_s18  }
  0xbd PF: > { %s319_s6 = sand.u32 1, %s565_s12   ;;  %p763_p11 = scmp.ne.s32.totalorder %s761_s27, 0 }
  0xbe   : > { %p764_p12 = scmp.ge.s32.totalorder %s585_s17, 2  ;;  %s320_s24 = scalar_lea.sflag [#allocation4], %s319_s6 }
  0xc0   : > { %p417_p0 = pnand %p764_p12, %p763_p11 }
  0xc2   : > { %p418_p1 = pneg %p417_p0 }
  0xc4   : > { %560 = dma.done.wait (%p418_p1), %s320_s24, 128  }
  0xc5   : > { %562 = vsyncadd (%p418_p1), %s320_s24, 4294967168  ;;  %s19_s17 = sadd.s32 1, %s585_s17   ;;  %s765_s12 = smov %s569_s13 }
  0xc6   : > { %p16_p2 = scmp.ge.s32.totalorder %s19_s17, 4   ;;  %s766_s13 = smov %s573_s14 }
  0xc7   : > { %s767_s14 = smov %s666_s26  ;;  %s768_s15 = smov %s581_s16 }
  0xc8   : > { %s769_s16 = smov %s771_s20  ;;  %18 = sbr.rel (!%p16_p2) target bundleno = 6 (0x6), region = 77 }
  0xcd   :  { %325 = vsyncpa [#allocation3], 1 }
  0xce   :  { %327 = vsyncpa [#allocation3 + $0x1], 1 }
  0xcf   :  { %328 = vsyncpa [#allocation4], 1 }
  0xd0   :  { %330 = vsyncpa [#allocation4 + $0x1], 1 }

</bundles_post_ra>
